<compile_context>
chip_gen: v5e
topology: v5e:2x2
jax: 0.10.0
libtpu: 0.0.40
codegen_flags: <defaults>
</compile_context>

<pallas_src>
import jax
import jax.numpy as jnp
from jax.experimental import pallas as pl
from jax.experimental.pallas import tpu as pltpu


def _rnn_kernel(x_ref, wi_ref, wh_ref, bh_ref, out_ref):
    # Static shapes:
    #   x_ref  : (L*Bp, E)  all timesteps, time-major rows, VMEM resident
    #   wi_ref : (E, H)     Wi^T (resident)
    #   wh_ref : (H, H)     Wh^T (resident)
    #   bh_ref : (1, H)     recurrent bias
    #   out_ref: (Bp, L*H)  lane-dense output slab; h_t lives in [:, t*H:(t+1)*H]
    LB, _ = x_ref.shape
    H = wh_ref.shape[0]
    Bp = out_ref.shape[0]
    L = LB // Bp

    # --- Prologue: input projection + bias hoisted off the recurrence -------
    # One (L*Bp, E)@(E, H) matmul + a single bias broadcast for all timesteps.
    x_proj = (
        jnp.dot(x_ref[...], wi_ref[...], preferred_element_type=jnp.float32)
        + bh_ref[...]
    )  # (L*Bp, H), f32

    wh = wh_ref[...]  # load once, reuse every step

    # --- Recurrence ----------------------------------------------------------
    # Fully unrolled (L static & small).  Per-step slice offsets t*Bp are
    # static multiples of 8 -> sublane-aligned, no layout fixup on the chain.
    h = jnp.zeros((Bp, H), jnp.float32)
    hs = []
    for t in range(L):
        pre = x_proj[t * Bp:(t + 1) * Bp, :] + jnp.dot(
            h, wh, preferred_element_type=jnp.float32)
        h = jnp.tanh(pre)
        hs.append(h)

    # --- Epilogue: ONE unmasked lane-dense store of the whole slab ----------
    out_ref[...] = jnp.concatenate(hs, axis=-1).astype(out_ref.dtype)


def rnn_forward(x, w_i, w_h, b_h):
    """Elman RNN forward.

    x: (L, B, E) f32; w_i: (H, E); w_h: (H, H); b_h: (H,).
    Returns (L, B, H): stacked hidden states h_1..h_L (== torch forward()).
    """
    L, B, E = x.shape
    H = w_h.shape[0]

    # Pad batch to a sublane multiple so every per-step slice inside the
    # kernel is (8k, .) aligned; padded rows are garbage and dropped below.
    Bp = max(8, ((B + 7) // 8) * 8)

    x_f32 = jnp.asarray(x, jnp.float32)
    if Bp != B:
        x_f32 = jnp.pad(x_f32, ((0, 0), (0, Bp - B), (0, 0)))
    x_flat = x_f32.reshape(L * Bp, E)                         # (L*Bp, E)

    # Pre-transpose weights so the kernel does plain row-major matmuls.
    wi_t = jnp.asarray(w_i, jnp.float32).T                    # (E, H)
    wh_t = jnp.asarray(w_h, jnp.float32).T                    # (H, H)
    bh2 = jnp.asarray(b_h, jnp.float32).reshape(1, H)         # (1, H)

    grid_spec = pltpu.PrefetchScalarGridSpec(
        num_scalar_prefetch=0,
        grid=(1,),  # single invocation: whole recurrence runs resident in VMEM
        in_specs=[
            pl.BlockSpec((L * Bp, E), lambda i: (0, 0)),   # all x rows
            pl.BlockSpec((E, H), lambda i: (0, 0)),        # Wi^T (resident)
            pl.BlockSpec((H, H), lambda i: (0, 0)),        # Wh^T (resident)
            pl.BlockSpec((1, H), lambda i: (0, 0)),        # b_h
        ],
        out_specs=pl.BlockSpec((Bp, L * H), lambda i: (0, 0)),  # lane-dense slab
    )

    out_slab = pl.pallas_call(
        _rnn_kernel,
        out_shape=jax.ShapeDtypeStruct((Bp, L * H), jnp.float32),
        grid_spec=grid_spec,
        compiler_params=pltpu.CompilerParams(
            dimension_semantics=("arbitrary",),  # recurrence is serial anyway
            # Toy shapes fit well under every chip's default scoped VMEM;
            # set vmem_limit_bytes explicitly only past toy sizes (see TODO).
        ),
    )(x_flat, wi_t, wh_t, bh2)

    # (Bp, L*H) -> drop batch padding -> (L, B, H).  Layout plumbing only.
    return out_slab[:B].reshape(B, L, H).transpose(1, 0, 2)


def rnn_forward_ref(x, w_i, w_h, b_h):
    """Pure-JAX reference of the PyTorch forward (for correctness check)."""
    L, B, _ = x.shape
    H = w_h.shape[0]

    def step(h, x_t):
        h_new = jnp.tanh(x_t @ w_i.T + h @ w_h.T + b_h)
        return h_new, h_new

    h0 = jnp.zeros((B, H), jnp.float32)
    _, hs = jax.lax.scan(step, h0, x)
    return hs  # (L, B, H)


if __name__ == "__main__":
    # Small shapes consistent with the module: seq=8, batch=2, emb=32, latent=32.
    L, B, E, H = 8, 2, 32, 32
    dim_output = 16  # decode head exists in the module; forward() doesn't use it.

    key = jax.random.PRNGKey(0)
    kx, ki, kh, kb, kd, kdb = jax.random.split(key, 6)

    x = jax.random.normal(kx, (L, B, E), dtype=jnp.float32)

    # Deterministic init matching nn.Linear's uniform(-1/sqrt(fan_in), +...).
    bound_i = 1.0 / (E ** 0.5)
    bound_h = 1.0 / (H ** 0.5)
    w_i = jax.random.uniform(ki, (H, E), jnp.float32, -bound_i, bound_i)   # lin_i (no bias)
    w_h = jax.random.uniform(kh, (H, H), jnp.float32, -bound_h, bound_h)   # lin_h weight
    b_h = jax.random.uniform(kb, (H,), jnp.float32, -bound_h, bound_h)     # lin_h bias
    # lin_d (decode head) params exist in __init__ but are not used by forward().
    w_d = jax.random.uniform(kd, (dim_output, H), jnp.float32, -bound_h, bound_h)
    b_d = jax.random.uniform(kdb, (dim_output,), jnp.float32, -bound_h, bound_h)

    out = jax.block_until_ready(rnn_forward(x, w_i, w_h, b_h))

    ref = rnn_forward_ref(x, w_i, w_h, b_h)
    assert out.shape == (L, B, H)
    assert jnp.allclose(out, ref, atol=1e-5, rtol=1e-4), "mismatch vs reference"

    print("KERNEL_OK")
</pallas_src>

<mosaic_0001>
module attributes {stable_mosaic.version = 11 : i64} {
  func.func @_rnn_kernel(%arg0: i32, %arg1: memref<64x32xf32, #tpu.memory_space<vmem>>, %arg2: memref<32x32xf32, #tpu.memory_space<vmem>>, %arg3: memref<32x32xf32, #tpu.memory_space<vmem>>, %arg4: memref<1x32xf32, #tpu.memory_space<vmem>>, %arg5: memref<8x256xf32, #tpu.memory_space<vmem>>) attributes {dimension_semantics = [#tpu.dimension_semantics<arbitrary>], iteration_bounds = array<i64: 1>, scalar_prefetch = 0 : i64, scratch_operands = 0 : i64, tpu.core_type = #tpu.core_type<tc>, window_params = [{pipeline_mode = #tpu.pipeline_mode<synchronous>, transform_indices = @transform_0, window_bounds = array<i64: 64, 32>}, {pipeline_mode = #tpu.pipeline_mode<synchronous>, transform_indices = @transform_1, window_bounds = array<i64: 32, 32>}, {pipeline_mode = #tpu.pipeline_mode<synchronous>, transform_indices = @transform_2, window_bounds = array<i64: 32, 32>}, {pipeline_mode = #tpu.pipeline_mode<synchronous>, transform_indices = @transform_3, window_bounds = array<i64: 1, 32>}, {pipeline_mode = #tpu.pipeline_mode<synchronous>, transform_indices = @transform_4, window_bounds = array<i64: 8, 256>}]} {
    %c0 = arith.constant 0 : index
    %c0_0 = arith.constant 0 : index
    %0 = vector.load %arg1[%c0, %c0_0] : memref<64x32xf32, #tpu.memory_space<vmem>>, vector<64x32xf32>
    %c0_1 = arith.constant 0 : index
    %c0_2 = arith.constant 0 : index
    %1 = vector.load %arg2[%c0_1, %c0_2] : memref<32x32xf32, #tpu.memory_space<vmem>>, vector<32x32xf32>
    %cst = arith.constant dense<0.000000e+00> : vector<64x32xf32>
    %2 = tpu.matmul %0, %1, %cst {dimension_numbers = #tpu.dot_dimension_numbers<[1], [0], [0], [1], [0, 0, 1, 1], [], []>} : vector<64x32xf32>, vector<32x32xf32>, vector<64x32xf32> -> vector<64x32xf32>
    %c0_3 = arith.constant 0 : index
    %c0_4 = arith.constant 0 : index
    %3 = vector.load %arg4[%c0_3, %c0_4] : memref<1x32xf32, #tpu.memory_space<vmem>>, vector<1x32xf32>
    %4 = vector.broadcast %3 : vector<1x32xf32> to vector<64x32xf32>
    %5 = arith.addf %2, %4 : vector<64x32xf32>
    %c0_5 = arith.constant 0 : index
    %c0_6 = arith.constant 0 : index
    %6 = vector.load %arg3[%c0_5, %c0_6] : memref<32x32xf32, #tpu.memory_space<vmem>>, vector<32x32xf32>
    %cst_7 = arith.constant 0.000000e+00 : f32
    %7 = vector.broadcast %cst_7 : f32 to vector<8x32xf32>
    %8 = vector.extract_strided_slice %5 {offsets = [0, 0], sizes = [8, 32], strides = [1, 1]} : vector<64x32xf32> to vector<8x32xf32>
    %cst_8 = arith.constant dense<0.000000e+00> : vector<8x32xf32>
    %9 = tpu.matmul %7, %6, %cst_8 {dimension_numbers = #tpu.dot_dimension_numbers<[1], [0], [0], [1], [0, 0, 1, 1], [], []>} : vector<8x32xf32>, vector<32x32xf32>, vector<8x32xf32> -> vector<8x32xf32>
    %10 = arith.addf %8, %9 : vector<8x32xf32>
    %11 = math.tanh %10 : vector<8x32xf32>
    %12 = vector.extract_strided_slice %5 {offsets = [8, 0], sizes = [8, 32], strides = [1, 1]} : vector<64x32xf32> to vector<8x32xf32>
    %cst_9 = arith.constant dense<0.000000e+00> : vector<8x32xf32>
    %13 = tpu.matmul %11, %6, %cst_9 {dimension_numbers = #tpu.dot_dimension_numbers<[1], [0], [0], [1], [0, 0, 1, 1], [], []>} : vector<8x32xf32>, vector<32x32xf32>, vector<8x32xf32> -> vector<8x32xf32>
    %14 = arith.addf %12, %13 : vector<8x32xf32>
    %15 = math.tanh %14 : vector<8x32xf32>
    %16 = vector.extract_strided_slice %5 {offsets = [16, 0], sizes = [8, 32], strides = [1, 1]} : vector<64x32xf32> to vector<8x32xf32>
    %cst_10 = arith.constant dense<0.000000e+00> : vector<8x32xf32>
    %17 = tpu.matmul %15, %6, %cst_10 {dimension_numbers = #tpu.dot_dimension_numbers<[1], [0], [0], [1], [0, 0, 1, 1], [], []>} : vector<8x32xf32>, vector<32x32xf32>, vector<8x32xf32> -> vector<8x32xf32>
    %18 = arith.addf %16, %17 : vector<8x32xf32>
    %19 = math.tanh %18 : vector<8x32xf32>
    %20 = vector.extract_strided_slice %5 {offsets = [24, 0], sizes = [8, 32], strides = [1, 1]} : vector<64x32xf32> to vector<8x32xf32>
    %cst_11 = arith.constant dense<0.000000e+00> : vector<8x32xf32>
    %21 = tpu.matmul %19, %6, %cst_11 {dimension_numbers = #tpu.dot_dimension_numbers<[1], [0], [0], [1], [0, 0, 1, 1], [], []>} : vector<8x32xf32>, vector<32x32xf32>, vector<8x32xf32> -> vector<8x32xf32>
    %22 = arith.addf %20, %21 : vector<8x32xf32>
    %23 = math.tanh %22 : vector<8x32xf32>
    %24 = vector.extract_strided_slice %5 {offsets = [32, 0], sizes = [8, 32], strides = [1, 1]} : vector<64x32xf32> to vector<8x32xf32>
    %cst_12 = arith.constant dense<0.000000e+00> : vector<8x32xf32>
    %25 = tpu.matmul %23, %6, %cst_12 {dimension_numbers = #tpu.dot_dimension_numbers<[1], [0], [0], [1], [0, 0, 1, 1], [], []>} : vector<8x32xf32>, vector<32x32xf32>, vector<8x32xf32> -> vector<8x32xf32>
    %26 = arith.addf %24, %25 : vector<8x32xf32>
    %27 = math.tanh %26 : vector<8x32xf32>
    %28 = vector.extract_strided_slice %5 {offsets = [40, 0], sizes = [8, 32], strides = [1, 1]} : vector<64x32xf32> to vector<8x32xf32>
    %cst_13 = arith.constant dense<0.000000e+00> : vector<8x32xf32>
    %29 = tpu.matmul %27, %6, %cst_13 {dimension_numbers = #tpu.dot_dimension_numbers<[1], [0], [0], [1], [0, 0, 1, 1], [], []>} : vector<8x32xf32>, vector<32x32xf32>, vector<8x32xf32> -> vector<8x32xf32>
    %30 = arith.addf %28, %29 : vector<8x32xf32>
    %31 = math.tanh %30 : vector<8x32xf32>
    %32 = vector.extract_strided_slice %5 {offsets = [48, 0], sizes = [8, 32], strides = [1, 1]} : vector<64x32xf32> to vector<8x32xf32>
    %cst_14 = arith.constant dense<0.000000e+00> : vector<8x32xf32>
    %33 = tpu.matmul %31, %6, %cst_14 {dimension_numbers = #tpu.dot_dimension_numbers<[1], [0], [0], [1], [0, 0, 1, 1], [], []>} : vector<8x32xf32>, vector<32x32xf32>, vector<8x32xf32> -> vector<8x32xf32>
    %34 = arith.addf %32, %33 : vector<8x32xf32>
    %35 = math.tanh %34 : vector<8x32xf32>
    %36 = vector.extract_strided_slice %5 {offsets = [56, 0], sizes = [8, 32], strides = [1, 1]} : vector<64x32xf32> to vector<8x32xf32>
    %cst_15 = arith.constant dense<0.000000e+00> : vector<8x32xf32>
    %37 = tpu.matmul %35, %6, %cst_15 {dimension_numbers = #tpu.dot_dimension_numbers<[1], [0], [0], [1], [0, 0, 1, 1], [], []>} : vector<8x32xf32>, vector<32x32xf32>, vector<8x32xf32> -> vector<8x32xf32>
    %38 = arith.addf %36, %37 : vector<8x32xf32>
    %39 = math.tanh %38 : vector<8x32xf32>
    %40 = tpu.concatenate %11, %15, %19, %23, %27, %31, %35, %39 in 1 : vector<8x32xf32>, vector<8x32xf32>, vector<8x32xf32>, vector<8x32xf32>, vector<8x32xf32>, vector<8x32xf32>, vector<8x32xf32>, vector<8x32xf32> -> vector<8x256xf32>
    %c0_16 = arith.constant 0 : index
    %c0_17 = arith.constant 0 : index
    %41 = vector.load %arg5[%c0_16, %c0_17] : memref<8x256xf32, #tpu.memory_space<vmem>>, vector<8x256xf32>
    tpu.vector_store %arg5[%c0_16, %c0_17], %40 {strides = array<i32>} : memref<8x256xf32, #tpu.memory_space<vmem>>, vector<8x256xf32>,
    return
  }
  func.func @transform_0(%arg0: i32) -> (i32, i32) {
    %c0_i32 = arith.constant 0 : i32
    %c0_i32_0 = arith.constant 0 : i32
    %c0_i32_1 = arith.constant 0 : i32
    return %c0_i32, %c0_i32_0 : i32, i32
  }
  func.func @transform_1(%arg0: i32) -> (i32, i32) {
    %c0_i32 = arith.constant 0 : i32
    %c0_i32_0 = arith.constant 0 : i32
    %c0_i32_1 = arith.constant 0 : i32
    return %c0_i32, %c0_i32_0 : i32, i32
  }
  func.func @transform_2(%arg0: i32) -> (i32, i32) {
    %c0_i32 = arith.constant 0 : i32
    %c0_i32_0 = arith.constant 0 : i32
    %c0_i32_1 = arith.constant 0 : i32
    return %c0_i32, %c0_i32_0 : i32, i32
  }
  func.func @transform_3(%arg0: i32) -> (i32, i32) {
    %c0_i32 = arith.constant 0 : i32
    %c0_i32_0 = arith.constant 0 : i32
    %c0_i32_1 = arith.constant 0 : i32
    return %c0_i32, %c0_i32_0 : i32, i32
  }
  func.func @transform_4(%arg0: i32) -> (i32, i32) {
    %c0_i32 = arith.constant 0 : i32
    %c0_i32_0 = arith.constant 0 : i32
    %c0_i32_1 = arith.constant 0 : i32
    return %c0_i32, %c0_i32_0 : i32, i32
  }
}

</mosaic_0001>

<bundles_post_ra>
// kernel: tpu_custom_call.1
= control target key start
LH: loop header
LB: loop body
LE: loop exit
PB: predicated region body
PF: predicated region fallthrough
CT: control target
= control target key end

     0   :  { %s548_s0 = inlined_call_operand.vmem [shape: f32[64,32], index: 0, kind: input, shape index: {}]   ;;  %s549_s1 = inlined_call_operand.vmem [shape: f32[32,32], index: 1, kind: input, shape index: {}]   ;;  %s550_s2 = inlined_call_operand.vmem [shape: f32[32,32], index: 2, kind: input, shape index: {}]   ;;  %s551_s3 = inlined_call_operand.vmem [shape: f32[1,32], index: 3, kind: input, shape index: {}]   ;;  %s552_s4 = inlined_call_operand.hbm [shape: f32[8,256], index: 4, kind: output, shape index: {}]  }
   0x1   :  { %v29_v0 = vld [vmem:[%s549_s1 + $0x18] sm:$0xff]  ;;  %v28_v1 = vld [vmem:[%s549_s1 + $0x10] sm:$0xff]  ;;  %v27_v2 = vld [vmem:[%s549_s1 + $0x8] sm:$0xff] }
   0x2   :  { %364 = vmatpush.msra.mxu1 %v29_v0  ;;  %71 = vmatpush.msra.mxu0 %v29_v0  ;;  %v26_v3 = vld [vmem:[%s549_s1] sm:$0xff] }
   0x3   :  { %365 = vmatpush.msra.mxu2 %v29_v0  ;;  %366 = vmatpush.msra.mxu3 %v29_v0 }
   0x4   :  { %367 = vmatpush.msra.mxu1 %v28_v1  ;;  %72 = vmatpush.msra.mxu0 %v28_v1 }
   0x5   :  { %368 = vmatpush.msra.mxu2 %v28_v1  ;;  %369 = vmatpush.msra.mxu3 %v28_v1 }
   0x6   :  { %9 = vsyncpa [#allocation3], 0  ;;  %370 = vmatpush.msra.mxu1 %v27_v2  ;;  %v22_v4 = vld [vmem:[%s548_s0 + $0x20] sm:$0xff]  ;;  %vm34_vm0 = vcmask 261120   ;;  %73 = vmatpush.msra.mxu0 %v27_v2  ;;  %v103_v6 = vld [vmem:[%s550_s2 + $0x18] sm:$0xff]  ;;  %v424_v10 = vmov 0.0  }
   0x7   :  { %v18_v5 = vld [vmem:[%s548_s0] sm:$0xff]  ;;  %371 = vmatpush.msra.mxu2 %v27_v2  ;;  %372 = vmatpush.msra.mxu3 %v27_v2  ;;  %v102_v7 = vld [vmem:[%s550_s2 + $0x10] sm:$0xff]  ;;  %v101_v8 = vld [vmem:[%s550_s2 + $0x8] sm:$0xff]  ;;  %s425_s18 = smov 32   ;;  %s426_s21 = smov 64   ;;  %vm324_vm1 = vcmask 523264  }
   0x8   :  { %373 = vmatpush.msra.mxu1 %v26_v3  ;;  %74 = vmatpush.msra.mxu0 %v26_v3  ;;  %v100_v9 = vld [vmem:[%s550_s2] sm:$0xff]  ;;  %v23_v11 = vld [vmem:[%s548_s0 + $0x28] sm:$0xff]  ;;  %v24_v20 = vld [vmem:[%s548_s0 + $0x30] sm:$0xff]  ;;  %vm326_vm2 = vcmask 785408   ;;  %s428_s22 = smov [#allocation2]   ;;  %s340_s26 = sshll.u32 %s552_s4, 4  ;;  %s341_s26 = int_to_ptr.hbm [resolvable:$true] %s340_s26 }
   0x9   :  { %353 = vmatmul.msk.f32.vlgmr.msra.gmra.mxu1 %vm34_vm0, %v22_v4  ;;  %349 = vmatmul.msk.f32.vlgmr.msra.gmra.mxu0 %vm34_vm0, %v18_v5  ;;  %v19_v12 = vld [vmem:[%s548_s0 + $0x8] sm:$0xff]  ;;  %v499_v15 = vld [vmem:[%s551_s3] ss:$0 sm:$0xff]  ;;  %v25_v21 = vld [vmem:[%s548_s0 + $0x38] sm:$0xff]  ;;  %s338_s23 = sshll.u32 %s428_s22, 4  ;;  %s339_s23 = int_to_ptr.vmem [resolvable:$true] %s338_s23 }
   0xa   :  { %119 = vmatpush.msrb.mxu1 %v103_v6  ;;  %374 = vmatpush.msra.mxu2 %v26_v3  ;;  %v20_v22 = vld [vmem:[%s548_s0 + $0x10] sm:$0xff]  ;;  %v21_v29 = vld [vmem:[%s548_s0 + $0x18] sm:$0xff]  ;;  %s427_s0 = smov 96  }
   0xb   :  { %375 = vmatpush.msra.mxu3 %v26_v3  ;;  %354 = vmatmul.msk.f32.vlgmr.msra.gmra.mxu2 %vm34_vm0, %v23_v11 }
   0xc   :  { %144 = vmatpush.msrb.mxu2 %v103_v6  ;;  %120 = vmatpush.msrb.mxu1 %v102_v7 }
   0xd   :  { %169 = vmatpush.msrb.mxu3 %v103_v6 }
   0xe   :  { %145 = vmatpush.msrb.mxu2 %v102_v7  ;;  %121 = vmatpush.msrb.mxu1 %v101_v8 }
   0xf   :  { %170 = vmatpush.msrb.mxu3 %v102_v7 }
  0x10   :  { %146 = vmatpush.msrb.mxu2 %v101_v8  ;;  %122 = vmatpush.msrb.mxu1 %v100_v9 }
  0x11   :  { %171 = vmatpush.msrb.mxu3 %v101_v8  ;;  %123 = vmatmul.f32.vlgmr.msrb.gmra.mxu1 %v424_v10 }
  0x12   :  { %147 = vmatpush.msrb.mxu2 %v100_v9  ;;  %194 = vmatpush.msra.mxu1 %v103_v6 }
  0x13   :  { %172 = vmatpush.msrb.mxu3 %v100_v9  ;;  %350 = vmatmul.msk.f32.gmra.mxu0 %vm34_vm0, %v19_v12 }
  0x14   :  { %195 = vmatpush.msra.mxu1 %v102_v7  ;;  %219 = vmatpush.msra.mxu2 %v103_v6 }
  0x15   :  { %355 = vmatmul.msk.f32.vlgmr.msra.gmra.mxu3 %vm34_vm0, %v24_v20 }
  0x16   :  { %196 = vmatpush.msra.mxu1 %v101_v8  ;;  %220 = vmatpush.msra.mxu2 %v102_v7 }
  0x17   :  { %244 = vmatpush.msra.mxu3 %v103_v6 }
  0x18   :  { %197 = vmatpush.msra.mxu1 %v100_v9  ;;  %221 = vmatpush.msra.mxu2 %v101_v8 }
  0x19   :  { %245 = vmatpush.msra.mxu3 %v102_v7 }
  0x1a   :  { %269 = vmatpush.msrb.mxu1 %v103_v6  ;;  %222 = vmatpush.msra.mxu2 %v100_v9 }
  0x1b   :  { %246 = vmatpush.msra.mxu3 %v101_v8  ;;  %351 = vmatmul.msk.f32.gmra.mxu0 %vm34_vm0, %v20_v22 }
  0x1c   :  { %270 = vmatpush.msrb.mxu1 %v102_v7 }
  0x1d   :  { %247 = vmatpush.msra.mxu3 %v100_v9 }
  0x1e   :  { %271 = vmatpush.msrb.mxu1 %v101_v8  ;;  %356 = vmatmul.msk.f32.gmra.mxu3 %vm34_vm0, %v25_v21 }
  0x20   :  { %272 = vmatpush.msrb.mxu1 %v100_v9 }
  0x23   :  { %352 = vmatmul.msk.f32.gmra.mxu0 %vm34_vm0, %v21_v29 }
  0x86   :  { %v494_v13 = vpop.f32.mrf.mxu1  ;;  %v76_v14 = vpop.f32.mrf.mxu0 }
  0x87   :  { %v77_v16 = vadd.f32 %v499_v15, %v76_v14  ;;  %v89_v48 = vadd.f32 %v499_v15, %v494_v13 }
  0x8e   :  { %v124_v17 = vpop.f32.mrf.mxu1  ;;  %v91_v23 = vpop.f32.mrf.mxu2 }
  0x8f   :  { %v127_v18 = vadd.f32 %v124_v17, %v77_v16  ;;  %v92_v52 = vadd.f32 %v499_v15, %v91_v23 }
  0x90   :  { %v79_v24 = vpop.f32.mrf.mxu0 }
  0x91   :  { %382 = vtanh.f32 %v127_v18  ;;  %v80_v25 = vadd.f32 %v499_v15, %v79_v24 }
  0x97   :  { %v383_v19 = vpop.eup %382 }
  0x98   :  { %357 = vmatmul.msk.f32.vlgmr.msrb.gmra.mxu2 %vm34_vm0, %v383_v19  ;;  %v94_v30 = vpop.f32.mrf.mxu3  ;;  %v82_v32 = vpop.f32.mrf.mxu0 }
  0x99   :  { %294 = vmatpush.msrb.mxu2 %v103_v6  ;;  %v83_v33 = vadd.f32 %v499_v15, %v82_v32  ;;  %v95_v56 = vadd.f32 %v499_v15, %v94_v30 }
  0x9b   :  { %295 = vmatpush.msrb.mxu2 %v102_v7 }
  0x9d   :  { %296 = vmatpush.msrb.mxu2 %v101_v8 }
  0x9f   :  { %297 = vmatpush.msrb.mxu2 %v100_v9 }
  0xa0   :  { %v85_v37 = vpop.f32.mrf.mxu0 }
  0xa1   :  { %v97_v31 = vpop.f32.mrf.mxu3  ;;  %v86_v38 = vadd.f32 %v499_v15, %v85_v37 }
  0xa2   :  { %v98_v60 = vadd.f32 %v499_v15, %v97_v31 }
 0x11b   :  { %v149_v26 = vpop.f32.mrf.mxu2 }
 0x11c   :  { %v152_v27 = vadd.f32 %v149_v26, %v80_v25 }
 0x11e   :  { %384 = vtanh.f32 %v152_v27 }
 0x124   :  { %v385_v28 = vpop.eup %384 }
 0x125   :  { %304 = vrot.lane.b32.xlu0 %v385_v28, %s425_s18  ;;  %358 = vmatmul.msk.f32.vlgmr.msrb.gmra.mxu3 %vm34_vm0, %v385_v28 }
 0x197   :  { %v305_v42 = vpop.permute.xlu0 %304 }
 0x198   :  { %v323_v44 = vsel %vm34_vm0, %v383_v19, %v305_v42 }
 0x1a8   :  { %v174_v34 = vpop.f32.mrf.mxu3 }
 0x1a9   :  { %v177_v35 = vadd.f32 %v174_v34, %v83_v33 }
 0x1ab   :  { %386 = vtanh.f32 %v177_v35 }
 0x1b1   :  { %v387_v36 = vpop.eup %386 }
 0x1b2   :  { %307 = vrot.lane.b32.xlu1 %v387_v36, %s426_s21  ;;  %359 = vmatmul.msk.f32.vlgmr.msra.gmra.mxu1 %vm34_vm0, %v387_v36 }
 0x224   :  { %v308_v43 = vpop.permute.xlu1 %307 }
 0x225   :  { %v325_v45 = vsel %vm324_vm1, %v323_v44, %v308_v43 }
 0x22f   :  { %v199_v39 = vpop.f32.mrf.mxu1 }
 0x230   :  { %v202_v40 = vadd.f32 %v199_v39, %v86_v38 }
 0x232   :  { %388 = vtanh.f32 %v202_v40 }
 0x238   :  { %v389_v41 = vpop.eup %388 }
 0x239   :  { %310 = vrot.lane.b32.xlu2 %v389_v41, %s427_s0  ;;  %360 = vmatmul.msk.f32.vlgmr.msra.gmra.mxu2 %vm34_vm0, %v389_v41 }
 0x293   :  { %v311_v46 = vpop.permute.xlu2 %310 }
 0x294   :  { %v327_v47 = vsel %vm326_vm2, %v325_v45, %v311_v46 }
 0x295   :  { %331 = vst [vmem:[#allocation2] sm:$0xff] %v327_v47 }
 0x2bc   :  { %v224_v49 = vpop.f32.mrf.mxu2 }
 0x2bd   :  { %v227_v50 = vadd.f32 %v224_v49, %v89_v48 }
 0x2bf   :  { %390 = vtanh.f32 %v227_v50 }
 0x2c5   :  { %v391_v51 = vpop.eup %390 }
 0x2c6   :  { %361 = vmatmul.msk.f32.vlgmr.msra.gmra.mxu3 %vm34_vm0, %v391_v51 }
 0x349   :  { %v249_v53 = vpop.f32.mrf.mxu3 }
 0x34a   :  { %v252_v54 = vadd.f32 %v249_v53, %v92_v52 }
 0x34c   :  { %392 = vtanh.f32 %v252_v54 }
 0x352   :  { %v393_v55 = vpop.eup %392 }
 0x353   :  { %313 = vrot.lane.b32.xlu0 %v393_v55, %s425_s18  ;;  %362 = vmatmul.msk.f32.vlgmr.msrb.gmra.mxu1 %vm34_vm0, %v393_v55 }
 0x3c5   :  { %v314_v0 = vpop.permute.xlu0 %313 }
 0x3c6   :  { %v328_v2 = vsel %vm34_vm0, %v391_v51, %v314_v0 }
 0x3d0   :  { %v274_v57 = vpop.f32.mrf.mxu1 }
 0x3d1   :  { %v277_v58 = vadd.f32 %v274_v57, %v95_v56 }
 0x3d3   :  { %394 = vtanh.f32 %v277_v58 }
 0x3d9   :  { %v395_v59 = vpop.eup %394 }
 0x3da   :  { %316 = vrot.lane.b32.xlu1 %v395_v59, %s426_s21  ;;  %363 = vmatmul.msk.f32.vlgmr.msrb.gmra.mxu2 %vm34_vm0, %v395_v59 }
 0x44c   :  { %v317_v1 = vpop.permute.xlu1 %316 }
 0x44d   :  { %v329_v3 = vsel %vm324_vm1, %v328_v2, %v317_v1 }
 0x45d   :  { %v299_v61 = vpop.f32.mrf.mxu2 }
 0x45e   :  { %v302_v62 = vadd.f32 %v299_v61, %v98_v60 }
 0x460   :  { %396 = vtanh.f32 %v302_v62 }
 0x466   :  { %v397_v63 = vpop.eup %396 }
 0x467   :  { %320 = vrot.lane.b32.xlu2 %v397_v63, %s427_s0 }
 0x4c1   :  { %v321_v4 = vpop.permute.xlu2 %320 }
 0x4c2   :  { %v330_v5 = vsel %vm326_vm2, %v329_v3, %v321_v4 }
 0x4c3   :  { %332 = vst [vmem:[#allocation2 + $0x8] sm:$0xff] %v330_v5 }
 0x4c4   :  { %343 = dma.vmem_to_hbm [thread:$0]  %s339_s23, 256, %s341_s26, [#allocation3]  }
 0x4c5   :  { %422 = dma.done.wait [#allocation3], 256  }
 0x4c6   :  { %423 = vsyncadd [#allocation3], 4294967040 }
 0x4c7   :  { %348 = vsyncpa [#allocation3], 1 }

</bundles_post_ra>
